<compile_context>
chip_gen: v5e
topology: v5e:2x2
jax: 0.10.0
libtpu: 0.0.40
codegen_flags: <defaults>
</compile_context>

<pallas_src>
from functools import partial

import jax
import jax.numpy as jnp
from jax.experimental import pallas as pl
from jax.experimental.pallas import tpu as pltpu

LANES = 128           # lane width (last dim)
MAX_TILE_R = 4096     # sublane-rows per grid step (multiple of 8)


def _tiling(n, max_tile_r):
    """Choose (tile_r, r_pad) for a batch of n elements laid out as (2, R, 128)."""
    r = -(-n // LANES)                 # rows of 128 batch elements
    r8 = -(-r // 8) * 8                # round rows up to a multiple of 8 sublanes
    tile_r = min(max_tile_r, r8)
    r_pad = -(-r8 // tile_r) * tile_r
    # v7x megacore: keep >= 2 grid steps when the problem is big enough.
    if r_pad // tile_r == 1 and tile_r >= 16 and tile_r % 16 == 0:
        tile_r //= 2
        r_pad = -(-r8 // tile_r) * tile_r
    return tile_r, r_pad


def nn1sig_kernel(x_ref, w0_ref, b0_ref, d_ref, o_ref):
    # x_ref / o_ref: (2, tile_r, 128) VMEM blocks, batch on (sublane, lane).
    # w0_ref: (4,) f32 SMEM (row-major W0), b0_ref: (2,) f32 SMEM,
    # d_ref: (3,) f32 SMEM = [W1[0,0]-W1[0,1], W1[1,0]-W1[1,1], b1[0]-b1[1]].
    x0 = x_ref[0]                                   # (tile_r, 128)
    x1 = x_ref[1]                                   # (tile_r, 128)

    # linear_0 + sigmoid as 2-term broadcast FMAs (VPU) + EUP sigmoids.
    h0 = jax.nn.sigmoid(w0_ref[0] * x0 + w0_ref[2] * x1 + b0_ref[0])
    h1 = jax.nn.sigmoid(w0_ref[1] * x0 + w0_ref[3] * x1 + b0_ref[1])

    # linear_1 + 2-class softmax fused: p0 = sigmoid(z0 - z1), p1 = 1 - p0.
    p0 = jax.nn.sigmoid(d_ref[0] * h0 + d_ref[1] * h1 + d_ref[2])
    o_ref[0] = p0
    o_ref[1] = 1.0 - p0


@partial(jax.jit, static_argnames=("max_tile_r",))
def nn1sig_forward(x, w0, b0, w1, b1, *, max_tile_r=MAX_TILE_R):
    n, fin = x.shape
    fout = w1.shape[1]
    assert fin == 2 and w0.shape == (2, 2) and w1.shape == (2, 2) and fout == 2

    tile_r, r_pad = _tiling(n, max_tile_r)
    n_pad = r_pad * LANES

    # (N, 2) -> (2, n_pad) -> (2, r_pad, 128): batch on sublanes+lanes.
    # (Fused with the kernel by jit; padded columns compute garbage that is
    # sliced away below.)
    x_t = jnp.pad(x.T.astype(jnp.float32), ((0, 0), (0, n_pad - n)))
    x_t = x_t.reshape(2, r_pad, LANES)

    # Tiny params -> SMEM scalars (row-major flattening matches x @ W).
    w0f = w0.reshape(-1).astype(jnp.float32)          # (4,)
    b0f = b0.reshape(-1).astype(jnp.float32)          # (2,)
    w1f = w1.astype(jnp.float32)
    b1f = b1.reshape(-1).astype(jnp.float32)
    d = jnp.stack([w1f[0, 0] - w1f[0, 1],
                   w1f[1, 0] - w1f[1, 1],
                   b1f[0] - b1f[1]])                   # (3,) logit-diff params

    smem = pl.BlockSpec(memory_space=pltpu.MemorySpace.SMEM)
    grid = (r_pad // tile_r,)

    out_t = pl.pallas_call(
        nn1sig_kernel,
        grid=grid,
        in_specs=[
            pl.BlockSpec((2, tile_r, LANES), lambda i: (0, i, 0)),  # x tiles
            smem, smem, smem,                                       # params
        ],
        out_specs=pl.BlockSpec((2, tile_r, LANES), lambda i: (0, i, 0)),
        out_shape=jax.ShapeDtypeStruct((2, r_pad, LANES), jnp.float32),
        compiler_params=pltpu.CompilerParams(
            dimension_semantics=("parallel",),       # shard rows across TCs (v7x)
            vmem_limit_bytes=32 * 1024 * 1024,       # tile_r<=4096 -> <=16 MiB used
        ),
        cost_estimate=pl.CostEstimate(
            flops=13 * n_pad,                        # two 2-term FMAs + fused softmax
            transcendentals=3 * n_pad,               # 3 sigmoids per element
            bytes_accessed=16 * n_pad + 4 * (4 + 2 + 3),
        ),
    )(x_t, w0f, b0f, d)

    # Back to the caller's (N, 2) layout, dropping padded columns.
    return out_t.reshape(2, n_pad)[:, :n].T


if __name__ == "__main__":
    key = jax.random.PRNGKey(0)
    k_x, k_w0, k_b0, k_w1, k_b1 = jax.random.split(key, 5)

    N, DIN, DHID, DOUT = 8, 2, 2, 2
    # Deterministic "LinearLayer" params, U(-1/sqrt(fan_in), 1/sqrt(fan_in))
    bound = 1.0 / jnp.sqrt(jnp.float32(DIN))
    x = jax.random.normal(k_x, (N, DIN), dtype=jnp.float32)
    w0 = jax.random.uniform(k_w0, (DIN, DHID), minval=-bound, maxval=bound, dtype=jnp.float32)
    b0 = jax.random.uniform(k_b0, (1, DHID), minval=-bound, maxval=bound, dtype=jnp.float32)
    w1 = jax.random.uniform(k_w1, (DHID, DOUT), minval=-bound, maxval=bound, dtype=jnp.float32)
    b1 = jax.random.uniform(k_b1, (1, DOUT), minval=-bound, maxval=bound, dtype=jnp.float32)

    out = nn1sig_forward(x, w0, b0, w1, b1)
    jax.block_until_ready(out)

    # Reference check in plain JAX
    h_ref = jax.nn.sigmoid(x @ w0 + b0)
    ref = jax.nn.softmax(h_ref @ w1 + b1, axis=-1)
    assert out.shape == (N, DOUT)
    assert jnp.allclose(out, ref, atol=1e-5, rtol=1e-5), "mismatch vs reference"
    assert jnp.allclose(jnp.sum(out, axis=-1), 1.0, atol=1e-5), "softmax rows must sum to 1"

    # Also exercise a larger batch that spans multiple grid steps / sublanes.
    N2 = 3000
    x2 = jax.random.normal(k_x, (N2, DIN), dtype=jnp.float32)
    out2 = nn1sig_forward(x2, w0, b0, w1, b1)
    jax.block_until_ready(out2)
    ref2 = jax.nn.softmax(jax.nn.sigmoid(x2 @ w0 + b0) @ w1 + b1, axis=-1)
    assert jnp.allclose(out2, ref2, atol=1e-5, rtol=1e-5), "large-batch mismatch"

    print("KERNEL_OK")
</pallas_src>

<mosaic_0001>
module attributes {stable_mosaic.version = 11 : i64} {
  func.func @nn1sig_kernel(%arg0: i32, %arg1: memref<2x8x128xf32, #tpu.memory_space<vmem>>, %arg2: memref<4xf32, #tpu.memory_space<smem>>, %arg3: memref<2xf32, #tpu.memory_space<smem>>, %arg4: memref<3xf32, #tpu.memory_space<smem>>, %arg5: memref<2x8x128xf32, #tpu.memory_space<vmem>>) attributes {dimension_semantics = [#tpu.dimension_semantics<parallel>], iteration_bounds = array<i64: 1>, scalar_prefetch = 0 : i64, scratch_operands = 0 : i64, tpu.core_type = #tpu.core_type<tc>, window_params = [{transform_indices = @transform_0, window_bounds = array<i64: 2, 8, 128>}, {transform_indices = @transform_1, window_bounds = array<i64: 4>}, {transform_indices = @transform_2, window_bounds = array<i64: 2>}, {transform_indices = @transform_3, window_bounds = array<i64: 3>}, {transform_indices = @transform_4, window_bounds = array<i64: 2, 8, 128>}]} {
    %c0 = arith.constant 0 : index
    %c0_0 = arith.constant 0 : index
    %c0_1 = arith.constant 0 : index
    %0 = vector.load %arg1[%c0, %c0_0, %c0_1] : memref<2x8x128xf32, #tpu.memory_space<vmem>>, vector<1x8x128xf32>
    %1 = vector.shape_cast %0 : vector<1x8x128xf32> to vector<8x128xf32>
    %c1 = arith.constant 1 : index
    %c0_2 = arith.constant 0 : index
    %c0_3 = arith.constant 0 : index
    %2 = vector.load %arg1[%c1, %c0_2, %c0_3] : memref<2x8x128xf32, #tpu.memory_space<vmem>>, vector<1x8x128xf32>
    %3 = vector.shape_cast %2 : vector<1x8x128xf32> to vector<8x128xf32>
    %c0_4 = arith.constant 0 : index
    %4 = memref.load %arg2[%c0_4] : memref<4xf32, #tpu.memory_space<smem>>
    %5 = vector.broadcast %4 : f32 to vector<8x128xf32>
    %6 = arith.mulf %5, %1 : vector<8x128xf32>
    %c2 = arith.constant 2 : index
    %7 = memref.load %arg2[%c2] : memref<4xf32, #tpu.memory_space<smem>>
    %8 = vector.broadcast %7 : f32 to vector<8x128xf32>
    %9 = arith.mulf %8, %3 : vector<8x128xf32>
    %10 = arith.addf %6, %9 : vector<8x128xf32>
    %c0_5 = arith.constant 0 : index
    %11 = memref.load %arg3[%c0_5] : memref<2xf32, #tpu.memory_space<smem>>
    %12 = vector.broadcast %11 : f32 to vector<8x128xf32>
    %13 = arith.addf %10, %12 : vector<8x128xf32>
    %14 = arith.negf %13 : vector<8x128xf32>
    %15 = math.exp %14 : vector<8x128xf32>
    %cst = arith.constant 1.000000e+00 : f32
    %16 = vector.broadcast %cst : f32 to vector<8x128xf32>
    %17 = arith.addf %16, %15 : vector<8x128xf32>
    %18 = arith.divf %16, %17 : vector<8x128xf32>
    %c1_6 = arith.constant 1 : index
    %19 = memref.load %arg2[%c1_6] : memref<4xf32, #tpu.memory_space<smem>>
    %20 = vector.broadcast %19 : f32 to vector<8x128xf32>
    %21 = arith.mulf %20, %1 : vector<8x128xf32>
    %c3 = arith.constant 3 : index
    %22 = memref.load %arg2[%c3] : memref<4xf32, #tpu.memory_space<smem>>
    %23 = vector.broadcast %22 : f32 to vector<8x128xf32>
    %24 = arith.mulf %23, %3 : vector<8x128xf32>
    %25 = arith.addf %21, %24 : vector<8x128xf32>
    %c1_7 = arith.constant 1 : index
    %26 = memref.load %arg3[%c1_7] : memref<2xf32, #tpu.memory_space<smem>>
    %27 = vector.broadcast %26 : f32 to vector<8x128xf32>
    %28 = arith.addf %25, %27 : vector<8x128xf32>
    %29 = arith.negf %28 : vector<8x128xf32>
    %30 = math.exp %29 : vector<8x128xf32>
    %cst_8 = arith.constant 1.000000e+00 : f32
    %31 = vector.broadcast %cst_8 : f32 to vector<8x128xf32>
    %32 = arith.addf %31, %30 : vector<8x128xf32>
    %33 = arith.divf %31, %32 : vector<8x128xf32>
    %c0_9 = arith.constant 0 : index
    %34 = memref.load %arg4[%c0_9] : memref<3xf32, #tpu.memory_space<smem>>
    %35 = vector.broadcast %34 : f32 to vector<8x128xf32>
    %36 = arith.mulf %35, %18 : vector<8x128xf32>
    %c1_10 = arith.constant 1 : index
    %37 = memref.load %arg4[%c1_10] : memref<3xf32, #tpu.memory_space<smem>>
    %38 = vector.broadcast %37 : f32 to vector<8x128xf32>
    %39 = arith.mulf %38, %33 : vector<8x128xf32>
    %40 = arith.addf %36, %39 : vector<8x128xf32>
    %c2_11 = arith.constant 2 : index
    %41 = memref.load %arg4[%c2_11] : memref<3xf32, #tpu.memory_space<smem>>
    %42 = vector.broadcast %41 : f32 to vector<8x128xf32>
    %43 = arith.addf %40, %42 : vector<8x128xf32>
    %44 = arith.negf %43 : vector<8x128xf32>
    %45 = math.exp %44 : vector<8x128xf32>
    %cst_12 = arith.constant 1.000000e+00 : f32
    %46 = vector.broadcast %cst_12 : f32 to vector<8x128xf32>
    %47 = arith.addf %46, %45 : vector<8x128xf32>
    %48 = arith.divf %46, %47 : vector<8x128xf32>
    %c0_13 = arith.constant 0 : index
    %c0_14 = arith.constant 0 : index
    %c0_15 = arith.constant 0 : index
    %49 = vector.load %arg5[%c0_13, %c0_14, %c0_15] : memref<2x8x128xf32, #tpu.memory_space<vmem>>, vector<1x8x128xf32>
    %50 = vector.shape_cast %49 : vector<1x8x128xf32> to vector<8x128xf32>
    %51 = vector.shape_cast %48 : vector<8x128xf32> to vector<1x8x128xf32>
    tpu.vector_store %arg5[%c0_13, %c0_14, %c0_15], %51 {strides = array<i32>} : memref<2x8x128xf32, #tpu.memory_space<vmem>>, vector<1x8x128xf32>,
    %cst_16 = arith.constant 1.000000e+00 : f32
    %52 = vector.broadcast %cst_16 : f32 to vector<8x128xf32>
    %53 = arith.subf %52, %48 : vector<8x128xf32>
    %c1_17 = arith.constant 1 : index
    %c0_18 = arith.constant 0 : index
    %c0_19 = arith.constant 0 : index
    %54 = vector.load %arg5[%c1_17, %c0_18, %c0_19] : memref<2x8x128xf32, #tpu.memory_space<vmem>>, vector<1x8x128xf32>
    %55 = vector.shape_cast %54 : vector<1x8x128xf32> to vector<8x128xf32>
    %56 = vector.shape_cast %53 : vector<8x128xf32> to vector<1x8x128xf32>
    tpu.vector_store %arg5[%c1_17, %c0_18, %c0_19], %56 {strides = array<i32>} : memref<2x8x128xf32, #tpu.memory_space<vmem>>, vector<1x8x128xf32>,
    return
  }
  func.func @transform_0(%arg0: i32) -> (i32, i32, i32) {
    %c0_i32 = arith.constant 0 : i32
    %c0_i32_0 = arith.constant 0 : i32
    %c0_i32_1 = arith.constant 0 : i32
    return %c0_i32, %arg0, %c0_i32_0 : i32, i32, i32
  }
  func.func @transform_1(%arg0: i32) -> i32 {
    %c0_i32 = arith.constant 0 : i32
    %c0_i32_0 = arith.constant 0 : i32
    return %c0_i32 : i32
  }
  func.func @transform_2(%arg0: i32) -> i32 {
    %c0_i32 = arith.constant 0 : i32
    %c0_i32_0 = arith.constant 0 : i32
    return %c0_i32 : i32
  }
  func.func @transform_3(%arg0: i32) -> i32 {
    %c0_i32 = arith.constant 0 : i32
    %c0_i32_0 = arith.constant 0 : i32
    return %c0_i32 : i32
  }
  func.func @transform_4(%arg0: i32) -> (i32, i32, i32) {
    %c0_i32 = arith.constant 0 : i32
    %c0_i32_0 = arith.constant 0 : i32
    %c0_i32_1 = arith.constant 0 : i32
    return %c0_i32, %arg0, %c0_i32_0 : i32, i32, i32
  }
}

</mosaic_0001>

<bundles_post_ra>
// kernel: nn1sig_forward.1
= control target key start
LH: loop header
LB: loop body
LE: loop exit
PB: predicated region body
PF: predicated region fallthrough
CT: control target
= control target key end

     0   :  { %9 = vsyncpa [#allocation3], 0  ;;  %s268_s0 = inlined_call_operand.vmem [shape: f32[2,8,128], index: 0, kind: input, shape index: {}]   ;;  %s269_s1 = inlined_call_operand.vmem [shape: f32[4], index: 1, kind: input, shape index: {}]   ;;  %s270_s2 = inlined_call_operand.vmem [shape: f32[2], index: 2, kind: input, shape index: {}]   ;;  %s271_s3 = inlined_call_operand.vmem [shape: f32[3], index: 3, kind: input, shape index: {}]   ;;  %s272_s4 = inlined_call_operand.vmem [shape: f32[2,8,128], index: 4, kind: output, shape index: {}]  }
   0x1   :  { %10 = vsyncpa [#allocation5], 0  ;;  %s27_s17 = sshll.u32 %s270_s2, 4  ;;  %s18_s20 = sshll.u32 %s269_s1, 4  ;;  %s28_s17 = int_to_ptr.vmem [resolvable:$true] %s27_s17  ;;  %s19_s20 = int_to_ptr.vmem [resolvable:$true] %s18_s20 }
   0x2   :  { %s219_s21 = smov [#allocation4]   ;;  %s220_s22 = smov [#allocation2]  }
   0x3   :  { %30 = dma.vmem_to_smem %s28_s17, 16, %s219_s21, [#allocation5]  }
   0x4   :  { %21 = dma.vmem_to_smem %s19_s20, 16, %s220_s22, [#allocation3]  }
   0x5   :  { %s36_s25 = sshll.u32 %s271_s3, 4  ;;  %s221_s26 = smov [#allocation6]   ;;  %s37_s25 = int_to_ptr.vmem [resolvable:$true] %s36_s25 }
   0x6   :  { %39 = dma.vmem_to_smem %s37_s25, 16, %s221_s26, [#allocation5]  }
   0x7   :  { %215 = dma.done.wait [#allocation3], 16  }
   0x8   :  { %216 = vsyncadd [#allocation3], 4294967280 }
   0x9   :  { %217 = dma.done.wait [#allocation5], 32  }
   0xa   :  { %218 = vsyncadd [#allocation5], 4294967264 }
   0xb   :  { %52 = sfence }
   0xc   :  { %s56_s2 = sld [smem:[#allocation2]]  ;;  %v53_v0 = vld [vmem:[%s268_s0] sm:$0xff]  ;;  %v153_v1 = vld [vmem:[%s268_s0 + $0x8] sm:$0xff] }
   0xd   :  { %s154_s27 = sld [smem:[#allocation2 + $0x2]] }
   0xe   :  { %s63_s1 = sld [smem:[#allocation4]] }
   0xf   :  { %s156_s28 = sld [smem:[#allocation2 + $0x1]] }
  0x10   :  { %s157_s5 = sld [smem:[#allocation2 + $0x3]] }
  0x11   :  { %s158_s3 = sld [smem:[#allocation4 + $0x1]] }
  0x12   :  { %v57_v2 = vstv %s56_s2  ;;  %s114_s0 = sld [smem:[#allocation6]] }
  0x13   :  { %v58_v3 = vmul.f32 %v57_v2, %v53_v0  ;;  %v60_v4 = vstv %s154_s27  ;;  %s160_s8 = sld [smem:[#allocation6 + $0x1]] }
  0x14   :  { %v61_v5 = vmul.f32 %v153_v1, %v60_v4  ;;  %v64_v6 = vstv %s63_s1  ;;  %s161_s9 = sld [smem:[#allocation6 + $0x2]] }
  0x15   :  { %v86_v7 = vstv %s156_s28 }
  0x16   :  { %v62_v8 = vadd.f32 %v61_v5, %v58_v3  ;;  %v87_v9 = vmul.f32 %v86_v7, %v53_v0  ;;  %v89_v10 = vstv %s157_s5 }
  0x17   :  { %v90_v11 = vmul.f32 %v153_v1, %v89_v10  ;;  %v93_v13 = vstv %s158_s3 }
  0x18   :  { %v65_v12 = vadd.f32 %v64_v6, %v62_v8  ;;  %v115_v38 = vstv %s114_s0 }
  0x19   :  { %v91_v14 = vadd.f32 %v90_v11, %v87_v9  ;;  %v118_v41 = vstv %s160_s8 }
  0x1a   :  { %v155_v15 = vmul.f32 -1.442695, %v65_v12  ;;  %v122_v46 = vstv %s161_s9 }
  0x1b   :  { %v94_v16 = vadd.f32 %v93_v13, %v91_v14 }
  0x1c   :  { %167 = vpow2.f32 %v155_v15 }
  0x1d   :  { %v159_v17 = vmul.f32 -1.442695, %v94_v16 }
  0x1f   :  { %169 = vpow2.f32 %v159_v17 }
  0x22   :  { %v168_v18 = vpop.eup %167 }
  0x23   :  { %v69_v19 = vadd.f32 1.0, %v168_v18 }
  0x25   :  { %v170_v20 = vpop.eup %169  ;;  %171 = vrcp.f32 %v69_v19  ;;  %v81_v24 = vand.u32 2147483648, %v69_v19  ;;  %vm75_vm0 = vweird.f32 %v69_v19  ;;  %v79_v27 = vand.u32 2147483647, %v69_v19 }
  0x26   :  { %v98_v21 = vadd.f32 1.0, %v170_v20 }
  0x27   :  { %v82_v30 = vor.u32 1.1754944e-38, %v81_v24  ;;  %vm80_vm5 = vcmp.eq.f32.partialorder %v79_v27, 8.507059e+37 }
  0x28   :  { %173 = vrcp.f32 %v98_v21  ;;  %v110_v31 = vand.u32 2147483648, %v98_v21  ;;  %vm104_vm3 = vweird.f32 %v98_v21  ;;  %v108_v33 = vand.u32 2147483647, %v98_v21 }
  0x2a   :  { %v111_v37 = vor.u32 1.1754944e-38, %v110_v31  ;;  %vm109_vm7 = vcmp.eq.f32.partialorder %v108_v33, 8.507059e+37 }
  0x2b   :  { %v172_v22 = vpop.eup %171 }
  0x2c   :  { %v71_v23 = vmul.f32 %v172_v22, %v69_v19  ;;  %vm76_vm1 = vweird.f32 %v172_v22 }
  0x2d   :  { %vm77_vm2 = vmor %vm75_vm0, %vm76_vm1 }
  0x2e   :  { %v174_v25 = vpop.eup %173  ;;  %v72_v26 = vsub.f32 1.0, %v71_v23 }
  0x2f   :  { %v100_v28 = vmul.f32 %v174_v25, %v98_v21  ;;  %vm105_vm4 = vweird.f32 %v174_v25 }
  0x30   :  { %v73_v29 = vmul.f32 %v172_v22, %v72_v26  ;;  %vm106_vm6 = vmor %vm104_vm3, %vm105_vm4 }
  0x31   :  { %v101_v32 = vsub.f32 1.0, %v100_v28 }
  0x32   :  { %v74_v34 = vadd.f32 %v172_v22, %v73_v29 }
  0x33   :  { %v102_v35 = vmul.f32 %v174_v25, %v101_v32 }
  0x34   :  { %v78_v36 = vsel %vm77_vm2, %v172_v22, %v74_v34 }
  0x35   :  { %v83_v39 = vsel %vm80_vm5, %v82_v30, %v78_v36  ;;  %v103_v40 = vadd.f32 %v174_v25, %v102_v35 }
  0x36   :  { %v116_v43 = vmul.f32 %v115_v38, %v83_v39 }
  0x37   :  { %v107_v42 = vsel %vm106_vm6, %v174_v25, %v103_v40 }
  0x38   :  { %v112_v44 = vsel %vm109_vm7, %v111_v37, %v107_v42 }
  0x39   :  { %v119_v45 = vmul.f32 %v118_v41, %v112_v44 }
  0x3b   :  { %v120_v47 = vadd.f32 %v119_v45, %v116_v43 }
  0x3d   :  { %v123_v48 = vadd.f32 %v122_v46, %v120_v47 }
  0x3f   :  { %v162_v49 = vmul.f32 -1.442695, %v123_v48 }
  0x41   :  { %175 = vpow2.f32 %v162_v49 }
  0x47   :  { %v176_v50 = vpop.eup %175 }
  0x48   :  { %v127_v51 = vadd.f32 1.0, %v176_v50 }
  0x4a   :  { %177 = vrcp.f32 %v127_v51  ;;  %v139_v54 = vand.u32 2147483648, %v127_v51  ;;  %vm133_vm8 = vweird.f32 %v127_v51  ;;  %v137_v56 = vand.u32 2147483647, %v127_v51 }
  0x4c   :  { %v140_v58 = vor.u32 1.1754944e-38, %v139_v54  ;;  %vm138_vm11 = vcmp.eq.f32.partialorder %v137_v56, 8.507059e+37 }
  0x50   :  { %v178_v52 = vpop.eup %177 }
  0x51   :  { %v129_v53 = vmul.f32 %v178_v52, %v127_v51  ;;  %vm134_vm9 = vweird.f32 %v178_v52 }
  0x52   :  { %vm135_vm10 = vmor %vm133_vm8, %vm134_vm9 }
  0x53   :  { %v130_v55 = vsub.f32 1.0, %v129_v53 }
  0x55   :  { %v131_v57 = vmul.f32 %v178_v52, %v130_v55 }
  0x57   :  { %v132_v59 = vadd.f32 %v178_v52, %v131_v57 }
  0x59   :  { %v136_v60 = vsel %vm135_vm10, %v178_v52, %v132_v59 }
  0x5a   :  { %v141_v61 = vsel %vm138_vm11, %v140_v58, %v136_v60 }
  0x5b   :  { %143 = vst [vmem:[%s272_s4] sm:$0xff] %v141_v61  ;;  %v144_v62 = vsub.f32 1.0, %v141_v61 }
  0x5d   :  { %163 = vst [vmem:[%s272_s4 + $0x8] sm:$0xff] %v144_v62 }
  0x5e   :  { %151 = vsyncpa [#allocation3], 1 }
  0x5f   :  { %152 = vsyncpa [#allocation5], 1 }

</bundles_post_ra>
